<compile_context>
chip_gen: v7x
topology: tpu7x:2x2x1
jax: 0.10.0
libtpu: 0.0.40
codegen_flags: <defaults>
</compile_context>

<pallas_src>
import math
import functools

import jax
import jax.numpy as jnp
from jax import lax
from jax.experimental import pallas as pl
from jax.experimental.pallas import tpu as pltpu


def _layernorm(x, w, b, eps=1e-5):
    mu = jnp.mean(x, axis=-1, keepdims=True)
    var = jnp.mean((x - mu) ** 2, axis=-1, keepdims=True)
    return (x - mu) * lax.rsqrt(var + eps) * w + b


def block_kernel(x_ref,
                 ln1w_ref, ln1b_ref,
                 wq_ref, bq_ref, wkv_ref, bkv_ref,
                 wp_ref, bp_ref,
                 ln2w_ref, ln2b_ref,
                 w1_ref, b1_ref, w2_ref, b2_ref,
                 o_ref,
                 heads_ref,
                 *, n_head, head_size, q_tile):
    T, C = x_ref.shape                      # batch dim squeezed by BlockSpec
    qi = pl.program_id(1)
    row0 = pl.multiple_of(qi * q_tile, q_tile)

    # ---- LayerNorm 1 (f32 math, bf16 matmul operands) ----
    ln1w = ln1w_ref[0]
    ln1b = ln1b_ref[0]
    x_all = x_ref[...]                      # (T, C) whole same-batch row slab
    x_q = x_ref[pl.ds(row0, q_tile), :]     # (q_tile, C) this query tile
    xn_kv = _layernorm(x_all, ln1w, ln1b).astype(jnp.bfloat16)
    xn_q = _layernorm(x_q, ln1w, ln1b).astype(jnp.bfloat16)

    # ---- projections: fused K|V over all rows, Q only over the query tile.
    # q pre-scaled by 1/sqrt(hs): equivalent to PyTorch's
    # masked_fill(-inf)-then-divide ordering with the additive -1e30 mask.
    inv_sqrt_hs = 1.0 / math.sqrt(head_size)
    q = (jnp.dot(xn_q, wq_ref[...], preferred_element_type=jnp.float32)
         + bq_ref[0]) * inv_sqrt_hs                         # (q_tile, C) f32
    kv = (jnp.dot(xn_kv, wkv_ref[...], preferred_element_type=jnp.float32)
          + bkv_ref[0])                                     # (T, 2C)    f32
    q_b = q.astype(jnp.bfloat16)
    k_b = kv[:, :C].astype(jnp.bfloat16)
    v_b = kv[:, C:].astype(jnp.bfloat16)

    # ---- causal mask generated in-kernel (no O(N^2) mask input) ----
    rows = row0 + lax.broadcasted_iota(jnp.int32, (q_tile, T), 0)
    cols = lax.broadcasted_iota(jnp.int32, (q_tile, T), 1)
    neg_bias = jnp.where(cols <= rows, 0.0, -1e30)          # (q_tile, T) f32

    # ---- per-head attention; head outputs go to a VMEM scratch at their lane
    # offset so the output projection below is ONE K=C matmul.
    # n_head is small & static and score temporaries are only (q_tile, T), so
    # the unrolled loop keeps live ranges bounded.
    for h in range(n_head):
        sl = slice(h * head_size, (h + 1) * head_size)
        s = jnp.einsum('qd,kd->qk', q_b[:, sl], k_b[:, sl],
                       preferred_element_type=jnp.float32) + neg_bias
        s = s - jnp.max(s, axis=-1, keepdims=True)          # softmax in f32
        p = jnp.exp(s)
        p = p * pl.reciprocal(jnp.sum(p, axis=-1, keepdims=True), approx=True)
        heads_ref[:, sl] = jnp.dot(p.astype(jnp.bfloat16), v_b[:, sl],
                                   preferred_element_type=jnp.float32)

    att = (jnp.dot(heads_ref[...].astype(jnp.bfloat16), wp_ref[...],
                   preferred_element_type=jnp.float32) + bp_ref[0])
    # dropout -> identity (eval)
    x1 = x_q + att

    # ---- LayerNorm 2 + FFN (exact erf GELU), bf16 matmuls / f32 elementwise --
    xn2 = _layernorm(x1, ln2w_ref[0], ln2b_ref[0])
    h1 = (jnp.dot(xn2.astype(jnp.bfloat16), w1_ref[...],
                  preferred_element_type=jnp.float32) + b1_ref[0])
    h1 = 0.5 * h1 * (1.0 + lax.erf(h1 * (1.0 / math.sqrt(2.0))))
    ff = (jnp.dot(h1.astype(jnp.bfloat16), w2_ref[...],
                  preferred_element_type=jnp.float32) + b2_ref[0])
    # dropout -> identity (eval)
    o_ref[...] = (x1 + ff).astype(o_ref.dtype)


def _pick_q_tile(T):
    """Largest query-row tile that divides T and satisfies the (8,128) rule."""
    if T <= 256:
        return T                      # full dim is always legal
    for cand in (256, 128, 64, 32, 16, 8):
        if T % cand == 0:
            return cand
    return T


def block_forward(x, params, *, n_head, head_size):
    B, T, C = x.shape
    H = 4 * C
    q_tile = _pick_q_tile(T)
    n_qt = T // q_tile

    def const_spec(shape):
        return pl.BlockSpec(shape, lambda b, qi: (0,) * len(shape))

    in_specs = [
        # whole same-batch row slab (needed for K/V); batch dim squeezed
        pl.BlockSpec((None, T, C), lambda b, qi: (b, 0, 0)),
        const_spec((1, C)), const_spec((1, C)),           # ln1 w, b
        const_spec((C, C)), const_spec((1, C)),           # Wq, bq
        const_spec((C, 2 * C)), const_spec((1, 2 * C)),   # fused W(k|v), b(k|v)
        const_spec((C, C)), const_spec((1, C)),           # Wproj, bproj
        const_spec((1, C)), const_spec((1, C)),           # ln2 w, b
        const_spec((C, H)), const_spec((1, H)),           # W1, b1
        const_spec((H, C)), const_spec((1, C)),           # W2, b2
    ]
    out_spec = pl.BlockSpec((None, q_tile, C), lambda b, qi: (b, qi, 0))

    kernel = functools.partial(block_kernel, n_head=n_head,
                               head_size=head_size, q_tile=q_tile)
    out = pl.pallas_call(
        kernel,
        out_shape=jax.ShapeDtypeStruct((B, T, C), x.dtype),
        grid_spec=pltpu.PrefetchScalarGridSpec(
            num_scalar_prefetch=0,
            grid=(B, n_qt),
            in_specs=in_specs,
            out_specs=out_spec,
            scratch_shapes=[pltpu.VMEM((q_tile, C), jnp.float32)]),
        compiler_params=pltpu.CompilerParams(
            dimension_semantics=("parallel", "parallel"),
            vmem_limit_bytes=32 * 1024 * 1024),
        # TODO(synk): for very long T add KV-block tiling with an online-softmax
        # accumulator and restrict each query tile's KV range to its causal
        # prefix; on v7x also single-buffer the grid-invariant weight specs
        # (pipeline_mode=pl.Buffered(1)) to fit larger row tiles in 64 MiB VMEM.
    )(x, *params)
    return out


def init_params(key, C, n_head, head_size):
    H = 4 * C
    ks = jax.random.split(key, 8)
    scale = 0.02

    def w(k, shape):
        return (scale * jax.random.normal(k, shape)).astype(jnp.float32)

    ln1w = jnp.ones((1, C), jnp.float32)
    ln1b = jnp.zeros((1, C), jnp.float32)
    # per-head q/k/v weights packed along the output dim (head order preserved)
    wq = w(ks[0], (C, n_head * head_size))
    wk = w(ks[1], (C, n_head * head_size))
    wv = w(ks[2], (C, n_head * head_size))
    wkv = jnp.concatenate([wk, wv], axis=1)               # fused K|V weight
    bq = jnp.zeros((1, n_head * head_size), jnp.float32)
    bkv = jnp.zeros((1, 2 * n_head * head_size), jnp.float32)
    wp = w(ks[3], (C, C))
    bp = jnp.zeros((1, C), jnp.float32)
    ln2w = jnp.ones((1, C), jnp.float32)
    ln2b = jnp.zeros((1, C), jnp.float32)
    w1 = w(ks[4], (C, H))
    b1 = jnp.zeros((1, H), jnp.float32)
    w2 = w(ks[5], (H, C))
    b2 = jnp.zeros((1, C), jnp.float32)

    bf = lambda a: a.astype(jnp.bfloat16)   # MXU operands stored in bf16
    return (ln1w, ln1b, bf(wq), bq, bf(wkv), bkv, bf(wp), bp,
            ln2w, ln2b, bf(w1), b1, bf(w2), b2)


def block_reference(x, params, *, n_head, head_size):
    """Pure-JAX f32 reference mirroring the PyTorch module (eval mode)."""
    (ln1w, ln1b, wq, bq, wkv, bkv, wp, bp,
     ln2w, ln2b, w1, b1, w2, b2) = params
    f32 = lambda a: a.astype(jnp.float32)
    wq, wkv, wp, w1, w2 = map(f32, (wq, wkv, wp, w1, w2))
    B, T, C = x.shape
    wk, wv = wkv[:, :C], wkv[:, C:]
    bk, bv = bkv[:, :C], bkv[:, C:]

    def ln(v, w_, b_):
        mu = v.mean(-1, keepdims=True)
        var = ((v - mu) ** 2).mean(-1, keepdims=True)
        return (v - mu) / jnp.sqrt(var + 1e-5) * w_[0] + b_[0]

    xn = ln(x, ln1w, ln1b)
    q = xn @ wq + bq[0]
    k = xn @ wk + bk[0]
    v = xn @ wv + bv[0]
    mask = jnp.tril(jnp.ones((T, T), bool))
    outs = []
    for h in range(n_head):
        sl = slice(h * head_size, (h + 1) * head_size)
        s = q[..., sl] @ jnp.swapaxes(k[..., sl], -1, -2)
        s = jnp.where(mask, s, -jnp.inf) / math.sqrt(head_size)
        p = jax.nn.softmax(s, axis=-1)
        outs.append(p @ v[..., sl])
    att = jnp.concatenate(outs, axis=-1) @ wp + bp[0]
    x = x + att
    xn2 = ln(x, ln2w, ln2b)
    h1 = xn2 @ w1 + b1[0]
    h1 = 0.5 * h1 * (1.0 + lax.erf(h1 / math.sqrt(2.0)))
    return x + (h1 @ w2 + b2[0])


if __name__ == "__main__":
    # config: n_embd=32, n_head=4, head_size=8, block_size>=T, dropout=0 (eval)
    B, T, C = 2, 8, 32
    n_head, head_size = 4, 8

    key = jax.random.PRNGKey(0)
    kx, kp = jax.random.split(key)
    x = jax.random.normal(kx, (B, T, C), dtype=jnp.float32)
    params = init_params(kp, C, n_head, head_size)

    out = block_forward(x, params, n_head=n_head, head_size=head_size)
    out = jax.block_until_ready(out)

    ref = block_reference(x, params, n_head=n_head, head_size=head_size)
    assert out.shape == (B, T, C)
    assert jnp.allclose(out, ref, rtol=5e-3, atol=5e-3), "mismatch vs reference"
    print("KERNEL_OK")
</pallas_src>

<mosaic_0001>
module attributes {stable_mosaic.version = 11 : i64} {
  func.func @block_kernel(%arg0: i32, %arg1: i32, %arg2: memref<1x8x32xf32, #tpu.memory_space<vmem>>, %arg3: memref<1x32xf32, #tpu.memory_space<vmem>>, %arg4: memref<1x32xf32, #tpu.memory_space<vmem>>, %arg5: memref<32x32xbf16, #tpu.memory_space<vmem>>, %arg6: memref<1x32xf32, #tpu.memory_space<vmem>>, %arg7: memref<32x64xbf16, #tpu.memory_space<vmem>>, %arg8: memref<1x64xf32, #tpu.memory_space<vmem>>, %arg9: memref<32x32xbf16, #tpu.memory_space<vmem>>, %arg10: memref<1x32xf32, #tpu.memory_space<vmem>>, %arg11: memref<1x32xf32, #tpu.memory_space<vmem>>, %arg12: memref<1x32xf32, #tpu.memory_space<vmem>>, %arg13: memref<32x128xbf16, #tpu.memory_space<vmem>>, %arg14: memref<1x128xf32, #tpu.memory_space<vmem>>, %arg15: memref<128x32xbf16, #tpu.memory_space<vmem>>, %arg16: memref<1x32xf32, #tpu.memory_space<vmem>>, %arg17: memref<1x8x32xf32, #tpu.memory_space<vmem>>, %arg18: memref<8x32xf32, #tpu.memory_space<vmem>>) attributes {dimension_semantics = [#tpu.dimension_semantics<parallel>, #tpu.dimension_semantics<parallel>], iteration_bounds = array<i64: 2, 1>, scalar_prefetch = 0 : i64, scratch_operands = 1 : i64, tpu.core_type = #tpu.core_type<tc>, window_params = [{transform_indices = @transform_0, window_bounds = array<i64: 1, 8, 32>}, {pipeline_mode = #tpu.pipeline_mode<synchronous>, transform_indices = @transform_1, window_bounds = array<i64: 1, 32>}, {pipeline_mode = #tpu.pipeline_mode<synchronous>, transform_indices = @transform_2, window_bounds = array<i64: 1, 32>}, {pipeline_mode = #tpu.pipeline_mode<synchronous>, transform_indices = @transform_3, window_bounds = array<i64: 32, 32>}, {pipeline_mode = #tpu.pipeline_mode<synchronous>, transform_indices = @transform_4, window_bounds = array<i64: 1, 32>}, {pipeline_mode = #tpu.pipeline_mode<synchronous>, transform_indices = @transform_5, window_bounds = array<i64: 32, 64>}, {pipeline_mode = #tpu.pipeline_mode<synchronous>, transform_indices = @transform_6, window_bounds = array<i64: 1, 64>}, {pipeline_mode = #tpu.pipeline_mode<synchronous>, transform_indices = @transform_7, window_bounds = array<i64: 32, 32>}, {pipeline_mode = #tpu.pipeline_mode<synchronous>, transform_indices = @transform_8, window_bounds = array<i64: 1, 32>}, {pipeline_mode = #tpu.pipeline_mode<synchronous>, transform_indices = @transform_9, window_bounds = array<i64: 1, 32>}, {pipeline_mode = #tpu.pipeline_mode<synchronous>, transform_indices = @transform_10, window_bounds = array<i64: 1, 32>}, {pipeline_mode = #tpu.pipeline_mode<synchronous>, transform_indices = @transform_11, window_bounds = array<i64: 32, 128>}, {pipeline_mode = #tpu.pipeline_mode<synchronous>, transform_indices = @transform_12, window_bounds = array<i64: 1, 128>}, {pipeline_mode = #tpu.pipeline_mode<synchronous>, transform_indices = @transform_13, window_bounds = array<i64: 128, 32>}, {pipeline_mode = #tpu.pipeline_mode<synchronous>, transform_indices = @transform_14, window_bounds = array<i64: 1, 32>}, {transform_indices = @transform_15, window_bounds = array<i64: 1, 8, 32>}]} {
    %c8_i32 = arith.constant 8 : i32
    %0 = arith.muli %arg1, %c8_i32 : i32
    %1 = tpu.assume_multiple %0, 8 : i32
    %c0 = arith.constant 0 : index
    %c0_0 = arith.constant 0 : index
    %2 = vector.load %arg3[%c0, %c0_0] : memref<1x32xf32, #tpu.memory_space<vmem>>, vector<1x32xf32>
    %3 = vector.shape_cast %2 : vector<1x32xf32> to vector<32xf32>
    %c0_1 = arith.constant 0 : index
    %c0_2 = arith.constant 0 : index
    %4 = vector.load %arg4[%c0_1, %c0_2] : memref<1x32xf32, #tpu.memory_space<vmem>>, vector<1x32xf32>
    %5 = vector.shape_cast %4 : vector<1x32xf32> to vector<32xf32>
    %c0_3 = arith.constant 0 : index
    %c0_4 = arith.constant 0 : index
    %c0_5 = arith.constant 0 : index
    %6 = vector.load %arg2[%c0_3, %c0_4, %c0_5] : memref<1x8x32xf32, #tpu.memory_space<vmem>>, vector<1x8x32xf32>
    %7 = vector.shape_cast %6 : vector<1x8x32xf32> to vector<8x32xf32>
    %c0_6 = arith.constant 0 : index
    %8 = arith.index_cast %1 : i32 to index
    %c0_7 = arith.constant 0 : index
    %9 = vector.load %arg2[%c0_6, %8, %c0_7] : memref<1x8x32xf32, #tpu.memory_space<vmem>>, vector<1x8x32xf32>
    %10 = vector.shape_cast %9 : vector<1x8x32xf32> to vector<8x32xf32>
    %cst = arith.constant dense<0.000000e+00> : vector<8xf32>
    %11 = vector.multi_reduction <add>, %7, %cst [1] : vector<8x32xf32> to vector<8xf32>
    %12 = vector.shape_cast %11 : vector<8xf32> to vector<8x1xf32>
    %cst_8 = arith.constant 3.200000e+01 : f32
    %13 = vector.broadcast %cst_8 : f32 to vector<8x1xf32>
    %14 = arith.divf %12, %13 : vector<8x1xf32>
    %15 = vector.broadcast %14 : vector<8x1xf32> to vector<8x32xf32>
    %16 = arith.subf %7, %15 : vector<8x32xf32>
    %17 = arith.mulf %16, %16 : vector<8x32xf32>
    %cst_9 = arith.constant dense<0.000000e+00> : vector<8xf32>
    %18 = vector.multi_reduction <add>, %17, %cst_9 [1] : vector<8x32xf32> to vector<8xf32>
    %19 = vector.shape_cast %18 : vector<8xf32> to vector<8x1xf32>
    %cst_10 = arith.constant 3.200000e+01 : f32
    %20 = vector.broadcast %cst_10 : f32 to vector<8x1xf32>
    %21 = arith.divf %19, %20 : vector<8x1xf32>
    %22 = vector.broadcast %14 : vector<8x1xf32> to vector<8x32xf32>
    %23 = arith.subf %7, %22 : vector<8x32xf32>
    %cst_11 = arith.constant 9.99999974E-6 : f32
    %24 = vector.broadcast %cst_11 : f32 to vector<8x1xf32>
    %25 = arith.addf %21, %24 : vector<8x1xf32>
    %26 = math.rsqrt %25 : vector<8x1xf32>
    %27 = vector.broadcast %26 : vector<8x1xf32> to vector<8x32xf32>
    %28 = arith.mulf %23, %27 : vector<8x32xf32>
    %29 = vector.shape_cast %3 : vector<32xf32> to vector<1x32xf32>
    %30 = vector.broadcast %29 : vector<1x32xf32> to vector<8x32xf32>
    %31 = arith.mulf %28, %30 : vector<8x32xf32>
    %32 = vector.shape_cast %5 : vector<32xf32> to vector<1x32xf32>
    %33 = vector.broadcast %32 : vector<1x32xf32> to vector<8x32xf32>
    %34 = arith.addf %31, %33 : vector<8x32xf32>
    %35 = arith.truncf %34 : vector<8x32xf32> to vector<8x32xbf16>
    %cst_12 = arith.constant dense<0.000000e+00> : vector<8xf32>
    %36 = vector.multi_reduction <add>, %10, %cst_12 [1] : vector<8x32xf32> to vector<8xf32>
    %37 = vector.shape_cast %36 : vector<8xf32> to vector<8x1xf32>
    %cst_13 = arith.constant 3.200000e+01 : f32
    %38 = vector.broadcast %cst_13 : f32 to vector<8x1xf32>
    %39 = arith.divf %37, %38 : vector<8x1xf32>
    %40 = vector.broadcast %39 : vector<8x1xf32> to vector<8x32xf32>
    %41 = arith.subf %10, %40 : vector<8x32xf32>
    %42 = arith.mulf %41, %41 : vector<8x32xf32>
    %cst_14 = arith.constant dense<0.000000e+00> : vector<8xf32>
    %43 = vector.multi_reduction <add>, %42, %cst_14 [1] : vector<8x32xf32> to vector<8xf32>
    %44 = vector.shape_cast %43 : vector<8xf32> to vector<8x1xf32>
    %cst_15 = arith.constant 3.200000e+01 : f32
    %45 = vector.broadcast %cst_15 : f32 to vector<8x1xf32>
    %46 = arith.divf %44, %45 : vector<8x1xf32>
    %47 = vector.broadcast %39 : vector<8x1xf32> to vector<8x32xf32>
    %48 = arith.subf %10, %47 : vector<8x32xf32>
    %cst_16 = arith.constant 9.99999974E-6 : f32
    %49 = vector.broadcast %cst_16 : f32 to vector<8x1xf32>
    %50 = arith.addf %46, %49 : vector<8x1xf32>
    %51 = math.rsqrt %50 : vector<8x1xf32>
    %52 = vector.broadcast %51 : vector<8x1xf32> to vector<8x32xf32>
    %53 = arith.mulf %48, %52 : vector<8x32xf32>
    %54 = vector.shape_cast %3 : vector<32xf32> to vector<1x32xf32>
    %55 = vector.broadcast %54 : vector<1x32xf32> to vector<8x32xf32>
    %56 = arith.mulf %53, %55 : vector<8x32xf32>
    %57 = vector.shape_cast %5 : vector<32xf32> to vector<1x32xf32>
    %58 = vector.broadcast %57 : vector<1x32xf32> to vector<8x32xf32>
    %59 = arith.addf %56, %58 : vector<8x32xf32>
    %60 = arith.truncf %59 : vector<8x32xf32> to vector<8x32xbf16>
    %c0_17 = arith.constant 0 : index
    %c0_18 = arith.constant 0 : index
    %61 = vector.load %arg5[%c0_17, %c0_18] : memref<32x32xbf16, #tpu.memory_space<vmem>>, vector<32x32xbf16>
    %cst_19 = arith.constant dense<0.000000e+00> : vector<8x32xf32>
    %62 = tpu.matmul %60, %61, %cst_19 {dimension_numbers = #tpu.dot_dimension_numbers<[1], [0], [0], [1], [0, 0, 1, 1], [], []>} : vector<8x32xbf16>, vector<32x32xbf16>, vector<8x32xf32> -> vector<8x32xf32>
    %c0_20 = arith.constant 0 : index
    %c0_21 = arith.constant 0 : index
    %63 = vector.load %arg6[%c0_20, %c0_21] : memref<1x32xf32, #tpu.memory_space<vmem>>, vector<1x32xf32>
    %64 = vector.shape_cast %63 : vector<1x32xf32> to vector<32xf32>
    %65 = vector.shape_cast %64 : vector<32xf32> to vector<1x32xf32>
    %66 = vector.broadcast %65 : vector<1x32xf32> to vector<8x32xf32>
    %67 = arith.addf %62, %66 : vector<8x32xf32>
    %cst_22 = arith.constant 0.353553385 : f32
    %68 = vector.broadcast %cst_22 : f32 to vector<8x32xf32>
    %69 = arith.mulf %67, %68 : vector<8x32xf32>
    %c0_23 = arith.constant 0 : index
    %c0_24 = arith.constant 0 : index
    %70 = vector.load %arg7[%c0_23, %c0_24] : memref<32x64xbf16, #tpu.memory_space<vmem>>, vector<32x64xbf16>
    %cst_25 = arith.constant dense<0.000000e+00> : vector<8x64xf32>
    %71 = tpu.matmul %35, %70, %cst_25 {dimension_numbers = #tpu.dot_dimension_numbers<[1], [0], [0], [1], [0, 0, 1, 1], [], []>} : vector<8x32xbf16>, vector<32x64xbf16>, vector<8x64xf32> -> vector<8x64xf32>
    %c0_26 = arith.constant 0 : index
    %c0_27 = arith.constant 0 : index
    %72 = vector.load %arg8[%c0_26, %c0_27] : memref<1x64xf32, #tpu.memory_space<vmem>>, vector<1x64xf32>
    %73 = vector.shape_cast %72 : vector<1x64xf32> to vector<64xf32>
    %74 = vector.shape_cast %73 : vector<64xf32> to vector<1x64xf32>
    %75 = vector.broadcast %74 : vector<1x64xf32> to vector<8x64xf32>
    %76 = arith.addf %71, %75 : vector<8x64xf32>
    %77 = arith.truncf %69 : vector<8x32xf32> to vector<8x32xbf16>
    %78 = vector.extract_strided_slice %76 {offsets = [0, 0], sizes = [8, 32], strides = [1, 1]} : vector<8x64xf32> to vector<8x32xf32>
    %79 = arith.truncf %78 : vector<8x32xf32> to vector<8x32xbf16>
    %80 = vector.extract_strided_slice %76 {offsets = [0, 32], sizes = [8, 32], strides = [1, 1]} : vector<8x64xf32> to vector<8x32xf32>
    %81 = arith.truncf %80 : vector<8x32xf32> to vector<8x32xbf16>
    %82 = tpu.iota {dimensions = array<i32: 0>} : vector<8x8xi32>
    %83 = vector.broadcast %1 : i32 to vector<8x8xi32>
    %84 = arith.addi %83, %82 : vector<8x8xi32>
    %85 = tpu.iota {dimensions = array<i32: 1>} : vector<8x8xi32>
    %86 = arith.cmpi sle, %85, %84 : vector<8x8xi32>
    %cst_28 = arith.constant 0.000000e+00 : f32
    %cst_29 = arith.constant -1.000000e+30 : f32
    %87 = vector.broadcast %cst_28 : f32 to vector<8x8xf32>
    %88 = vector.broadcast %cst_29 : f32 to vector<8x8xf32>
    %89 = arith.select %86, %87, %88 : vector<8x8xi1>, vector<8x8xf32>
    %90 = vector.extract_strided_slice %77 {offsets = [0, 0], sizes = [8, 8], strides = [1, 1]} : vector<8x32xbf16> to vector<8x8xbf16>
    %91 = vector.extract_strided_slice %79 {offsets = [0, 0], sizes = [8, 8], strides = [1, 1]} : vector<8x32xbf16> to vector<8x8xbf16>
    "tpu.trace_start"() <{level = 10 : i32, message = "qd,kd->qk"}> : () -> ()
    %cst_30 = arith.constant dense<0.000000e+00> : vector<8x8xf32>
    %92 = tpu.matmul %90, %91, %cst_30 {dimension_numbers = #tpu.dot_dimension_numbers<[1], [1], [0], [0], [0, 0, 1, 0], [], []>} : vector<8x8xbf16>, vector<8x8xbf16>, vector<8x8xf32> -> vector<8x8xf32>
    "tpu.trace_stop"() : () -> ()
    %93 = arith.addf %92, %89 : vector<8x8xf32>
    %cst_31 = arith.constant dense<0xFF800000> : vector<8xf32>
    %94 = vector.multi_reduction <maximumf>, %93, %cst_31 [1] : vector<8x8xf32> to vector<8xf32>
    %95 = vector.shape_cast %94 : vector<8xf32> to vector<8x1xf32>
    %96 = vector.broadcast %95 : vector<8x1xf32> to vector<8x8xf32>
    %97 = arith.subf %93, %96 : vector<8x8xf32>
    %98 = math.exp %97 : vector<8x8xf32>
    %cst_32 = arith.constant dense<0.000000e+00> : vector<8xf32>
    %99 = vector.multi_reduction <add>, %98, %cst_32 [1] : vector<8x8xf32> to vector<8xf32>
    %100 = vector.shape_cast %99 : vector<8xf32> to vector<8x1xf32>
    %101 = tpu.reciprocal %100 {approx = true} : vector<8x1xf32> -> vector<8x1xf32>
    %102 = vector.broadcast %101 : vector<8x1xf32> to vector<8x8xf32>
    %103 = arith.mulf %98, %102 : vector<8x8xf32>
    %104 = arith.truncf %103 : vector<8x8xf32> to vector<8x8xbf16>
    %105 = vector.extract_strided_slice %81 {offsets = [0, 0], sizes = [8, 8], strides = [1, 1]} : vector<8x32xbf16> to vector<8x8xbf16>
    %cst_33 = arith.constant dense<0.000000e+00> : vector<8x8xf32>
    %106 = tpu.matmul %104, %105, %cst_33 {dimension_numbers = #tpu.dot_dimension_numbers<[1], [0], [0], [1], [0, 0, 1, 1], [], []>} : vector<8x8xbf16>, vector<8x8xbf16>, vector<8x8xf32> -> vector<8x8xf32>
    %c0_34 = arith.constant 0 : index
    %c0_35 = arith.constant 0 : index
    %107 = vector.load %arg18[%c0_34, %c0_35] : memref<8x32xf32, #tpu.memory_space<vmem>>, vector<8x8xf32>
    tpu.vector_store %arg18[%c0_34, %c0_35], %106 {strides = array<i32>} : memref<8x32xf32, #tpu.memory_space<vmem>>, vector<8x8xf32>,
    %108 = vector.extract_strided_slice %77 {offsets = [0, 8], sizes = [8, 8], strides = [1, 1]} : vector<8x32xbf16> to vector<8x8xbf16>
    %109 = vector.extract_strided_slice %79 {offsets = [0, 8], sizes = [8, 8], strides = [1, 1]} : vector<8x32xbf16> to vector<8x8xbf16>
    "tpu.trace_start"() <{level = 10 : i32, message = "qd,kd->qk"}> : () -> ()
    %cst_36 = arith.constant dense<0.000000e+00> : vector<8x8xf32>
    %110 = tpu.matmul %108, %109, %cst_36 {dimension_numbers = #tpu.dot_dimension_numbers<[1], [1], [0], [0], [0, 0, 1, 0], [], []>} : vector<8x8xbf16>, vector<8x8xbf16>, vector<8x8xf32> -> vector<8x8xf32>
    "tpu.trace_stop"() : () -> ()
    %111 = arith.addf %110, %89 : vector<8x8xf32>
    %cst_37 = arith.constant dense<0xFF800000> : vector<8xf32>
    %112 = vector.multi_reduction <maximumf>, %111, %cst_37 [1] : vector<8x8xf32> to vector<8xf32>
    %113 = vector.shape_cast %112 : vector<8xf32> to vector<8x1xf32>
    %114 = vector.broadcast %113 : vector<8x1xf32> to vector<8x8xf32>
    %115 = arith.subf %111, %114 : vector<8x8xf32>
    %116 = math.exp %115 : vector<8x8xf32>
    %cst_38 = arith.constant dense<0.000000e+00> : vector<8xf32>
    %117 = vector.multi_reduction <add>, %116, %cst_38 [1] : vector<8x8xf32> to vector<8xf32>
    %118 = vector.shape_cast %117 : vector<8xf32> to vector<8x1xf32>
    %119 = tpu.reciprocal %118 {approx = true} : vector<8x1xf32> -> vector<8x1xf32>
    %120 = vector.broadcast %119 : vector<8x1xf32> to vector<8x8xf32>
    %121 = arith.mulf %116, %120 : vector<8x8xf32>
    %122 = arith.truncf %121 : vector<8x8xf32> to vector<8x8xbf16>
    %123 = vector.extract_strided_slice %81 {offsets = [0, 8], sizes = [8, 8], strides = [1, 1]} : vector<8x32xbf16> to vector<8x8xbf16>
    %cst_39 = arith.constant dense<0.000000e+00> : vector<8x8xf32>
    %124 = tpu.matmul %122, %123, %cst_39 {dimension_numbers = #tpu.dot_dimension_numbers<[1], [0], [0], [1], [0, 0, 1, 1], [], []>} : vector<8x8xbf16>, vector<8x8xbf16>, vector<8x8xf32> -> vector<8x8xf32>
    %c0_40 = arith.constant 0 : index
    %c8 = arith.constant 8 : index
    %125 = vector.load %arg18[%c0_40, %c8] : memref<8x32xf32, #tpu.memory_space<vmem>>, vector<8x8xf32>
    tpu.vector_store %arg18[%c0_40, %c8], %124 {strides = array<i32>} : memref<8x32xf32, #tpu.memory_space<vmem>>, vector<8x8xf32>,
    %126 = vector.extract_strided_slice %77 {offsets = [0, 16], sizes = [8, 8], strides = [1, 1]} : vector<8x32xbf16> to vector<8x8xbf16>
    %127 = vector.extract_strided_slice %79 {offsets = [0, 16], sizes = [8, 8], strides = [1, 1]} : vector<8x32xbf16> to vector<8x8xbf16>
    "tpu.trace_start"() <{level = 10 : i32, message = "qd,kd->qk"}> : () -> ()
    %cst_41 = arith.constant dense<0.000000e+00> : vector<8x8xf32>
    %128 = tpu.matmul %126, %127, %cst_41 {dimension_numbers = #tpu.dot_dimension_numbers<[1], [1], [0], [0], [0, 0, 1, 0], [], []>} : vector<8x8xbf16>, vector<8x8xbf16>, vector<8x8xf32> -> vector<8x8xf32>
    "tpu.trace_stop"() : () -> ()
    %129 = arith.addf %128, %89 : vector<8x8xf32>
    %cst_42 = arith.constant dense<0xFF800000> : vector<8xf32>
    %130 = vector.multi_reduction <maximumf>, %129, %cst_42 [1] : vector<8x8xf32> to vector<8xf32>
    %131 = vector.shape_cast %130 : vector<8xf32> to vector<8x1xf32>
    %132 = vector.broadcast %131 : vector<8x1xf32> to vector<8x8xf32>
    %133 = arith.subf %129, %132 : vector<8x8xf32>
    %134 = math.exp %133 : vector<8x8xf32>
    %cst_43 = arith.constant dense<0.000000e+00> : vector<8xf32>
    %135 = vector.multi_reduction <add>, %134, %cst_43 [1] : vector<8x8xf32> to vector<8xf32>
    %136 = vector.shape_cast %135 : vector<8xf32> to vector<8x1xf32>
    %137 = tpu.reciprocal %136 {approx = true} : vector<8x1xf32> -> vector<8x1xf32>
    %138 = vector.broadcast %137 : vector<8x1xf32> to vector<8x8xf32>
    %139 = arith.mulf %134, %138 : vector<8x8xf32>
    %140 = arith.truncf %139 : vector<8x8xf32> to vector<8x8xbf16>
    %141 = vector.extract_strided_slice %81 {offsets = [0, 16], sizes = [8, 8], strides = [1, 1]} : vector<8x32xbf16> to vector<8x8xbf16>
    %cst_44 = arith.constant dense<0.000000e+00> : vector<8x8xf32>
    %142 = tpu.matmul %140, %141, %cst_44 {dimension_numbers = #tpu.dot_dimension_numbers<[1], [0], [0], [1], [0, 0, 1, 1], [], []>} : vector<8x8xbf16>, vector<8x8xbf16>, vector<8x8xf32> -> vector<8x8xf32>
    %c0_45 = arith.constant 0 : index
    %c16 = arith.constant 16 : index
    %143 = vector.load %arg18[%c0_45, %c16] : memref<8x32xf32, #tpu.memory_space<vmem>>, vector<8x8xf32>
    tpu.vector_store %arg18[%c0_45, %c16], %142 {strides = array<i32>} : memref<8x32xf32, #tpu.memory_space<vmem>>, vector<8x8xf32>,
    %144 = vector.extract_strided_slice %77 {offsets = [0, 24], sizes = [8, 8], strides = [1, 1]} : vector<8x32xbf16> to vector<8x8xbf16>
    %145 = vector.extract_strided_slice %79 {offsets = [0, 24], sizes = [8, 8], strides = [1, 1]} : vector<8x32xbf16> to vector<8x8xbf16>
    "tpu.trace_start"() <{level = 10 : i32, message = "qd,kd->qk"}> : () -> ()
    %cst_46 = arith.constant dense<0.000000e+00> : vector<8x8xf32>
    %146 = tpu.matmul %144, %145, %cst_46 {dimension_numbers = #tpu.dot_dimension_numbers<[1], [1], [0], [0], [0, 0, 1, 0], [], []>} : vector<8x8xbf16>, vector<8x8xbf16>, vector<8x8xf32> -> vector<8x8xf32>
    "tpu.trace_stop"() : () -> ()
    %147 = arith.addf %146, %89 : vector<8x8xf32>
    %cst_47 = arith.constant dense<0xFF800000> : vector<8xf32>
    %148 = vector.multi_reduction <maximumf>, %147, %cst_47 [1] : vector<8x8xf32> to vector<8xf32>
    %149 = vector.shape_cast %148 : vector<8xf32> to vector<8x1xf32>
    %150 = vector.broadcast %149 : vector<8x1xf32> to vector<8x8xf32>
    %151 = arith.subf %147, %150 : vector<8x8xf32>
    %152 = math.exp %151 : vector<8x8xf32>
    %cst_48 = arith.constant dense<0.000000e+00> : vector<8xf32>
    %153 = vector.multi_reduction <add>, %152, %cst_48 [1] : vector<8x8xf32> to vector<8xf32>
    %154 = vector.shape_cast %153 : vector<8xf32> to vector<8x1xf32>
    %155 = tpu.reciprocal %154 {approx = true} : vector<8x1xf32> -> vector<8x1xf32>
    %156 = vector.broadcast %155 : vector<8x1xf32> to vector<8x8xf32>
    %157 = arith.mulf %152, %156 : vector<8x8xf32>
    %158 = arith.truncf %157 : vector<8x8xf32> to vector<8x8xbf16>
    %159 = vector.extract_strided_slice %81 {offsets = [0, 24], sizes = [8, 8], strides = [1, 1]} : vector<8x32xbf16> to vector<8x8xbf16>
    %cst_49 = arith.constant dense<0.000000e+00> : vector<8x8xf32>
    %160 = tpu.matmul %158, %159, %cst_49 {dimension_numbers = #tpu.dot_dimension_numbers<[1], [0], [0], [1], [0, 0, 1, 1], [], []>} : vector<8x8xbf16>, vector<8x8xbf16>, vector<8x8xf32> -> vector<8x8xf32>
    %c0_50 = arith.constant 0 : index
    %c24 = arith.constant 24 : index
    %161 = vector.load %arg18[%c0_50, %c24] : memref<8x32xf32, #tpu.memory_space<vmem>>, vector<8x8xf32>
    tpu.vector_store %arg18[%c0_50, %c24], %160 {strides = array<i32>} : memref<8x32xf32, #tpu.memory_space<vmem>>, vector<8x8xf32>,
    %c0_51 = arith.constant 0 : index
    %c0_52 = arith.constant 0 : index
    %162 = vector.load %arg18[%c0_51, %c0_52] : memref<8x32xf32, #tpu.memory_space<vmem>>, vector<8x32xf32>
    %163 = arith.truncf %162 : vector<8x32xf32> to vector<8x32xbf16>
    %c0_53 = arith.constant 0 : index
    %c0_54 = arith.constant 0 : index
    %164 = vector.load %arg9[%c0_53, %c0_54] : memref<32x32xbf16, #tpu.memory_space<vmem>>, vector<32x32xbf16>
    %cst_55 = arith.constant dense<0.000000e+00> : vector<8x32xf32>
    %165 = tpu.matmul %163, %164, %cst_55 {dimension_numbers = #tpu.dot_dimension_numbers<[1], [0], [0], [1], [0, 0, 1, 1], [], []>} : vector<8x32xbf16>, vector<32x32xbf16>, vector<8x32xf32> -> vector<8x32xf32>
    %c0_56 = arith.constant 0 : index
    %c0_57 = arith.constant 0 : index
    %166 = vector.load %arg10[%c0_56, %c0_57] : memref<1x32xf32, #tpu.memory_space<vmem>>, vector<1x32xf32>
    %167 = vector.shape_cast %166 : vector<1x32xf32> to vector<32xf32>
    %168 = vector.shape_cast %167 : vector<32xf32> to vector<1x32xf32>
    %169 = vector.broadcast %168 : vector<1x32xf32> to vector<8x32xf32>
    %170 = arith.addf %165, %169 : vector<8x32xf32>
    %171 = arith.addf %10, %170 : vector<8x32xf32>
    %c0_58 = arith.constant 0 : index
    %c0_59 = arith.constant 0 : index
    %172 = vector.load %arg11[%c0_58, %c0_59] : memref<1x32xf32, #tpu.memory_space<vmem>>, vector<1x32xf32>
    %173 = vector.shape_cast %172 : vector<1x32xf32> to vector<32xf32>
    %c0_60 = arith.constant 0 : index
    %c0_61 = arith.constant 0 : index
    %174 = vector.load %arg12[%c0_60, %c0_61] : memref<1x32xf32, #tpu.memory_space<vmem>>, vector<1x32xf32>
    %175 = vector.shape_cast %174 : vector<1x32xf32> to vector<32xf32>
    %cst_62 = arith.constant dense<0.000000e+00> : vector<8xf32>
    %176 = vector.multi_reduction <add>, %171, %cst_62 [1] : vector<8x32xf32> to vector<8xf32>
    %177 = vector.shape_cast %176 : vector<8xf32> to vector<8x1xf32>
    %cst_63 = arith.constant 3.200000e+01 : f32
    %178 = vector.broadcast %cst_63 : f32 to vector<8x1xf32>
    %179 = arith.divf %177, %178 : vector<8x1xf32>
    %180 = vector.broadcast %179 : vector<8x1xf32> to vector<8x32xf32>
    %181 = arith.subf %171, %180 : vector<8x32xf32>
    %182 = arith.mulf %181, %181 : vector<8x32xf32>
    %cst_64 = arith.constant dense<0.000000e+00> : vector<8xf32>
    %183 = vector.multi_reduction <add>, %182, %cst_64 [1] : vector<8x32xf32> to vector<8xf32>
    %184 = vector.shape_cast %183 : vector<8xf32> to vector<8x1xf32>
    %cst_65 = arith.constant 3.200000e+01 : f32
    %185 = vector.broadcast %cst_65 : f32 to vector<8x1xf32>
    %186 = arith.divf %184, %185 : vector<8x1xf32>
    %187 = vector.broadcast %179 : vector<8x1xf32> to vector<8x32xf32>
    %188 = arith.subf %171, %187 : vector<8x32xf32>
    %cst_66 = arith.constant 9.99999974E-6 : f32
    %189 = vector.broadcast %cst_66 : f32 to vector<8x1xf32>
    %190 = arith.addf %186, %189 : vector<8x1xf32>
    %191 = math.rsqrt %190 : vector<8x1xf32>
    %192 = vector.broadcast %191 : vector<8x1xf32> to vector<8x32xf32>
    %193 = arith.mulf %188, %192 : vector<8x32xf32>
    %194 = vector.shape_cast %173 : vector<32xf32> to vector<1x32xf32>
    %195 = vector.broadcast %194 : vector<1x32xf32> to vector<8x32xf32>
    %196 = arith.mulf %193, %195 : vector<8x32xf32>
    %197 = vector.shape_cast %175 : vector<32xf32> to vector<1x32xf32>
    %198 = vector.broadcast %197 : vector<1x32xf32> to vector<8x32xf32>
    %199 = arith.addf %196, %198 : vector<8x32xf32>
    %200 = arith.truncf %199 : vector<8x32xf32> to vector<8x32xbf16>
    %c0_67 = arith.constant 0 : index
    %c0_68 = arith.constant 0 : index
    %201 = vector.load %arg13[%c0_67, %c0_68] : memref<32x128xbf16, #tpu.memory_space<vmem>>, vector<32x128xbf16>
    %cst_69 = arith.constant dense<0.000000e+00> : vector<8x128xf32>
    %202 = tpu.matmul %200, %201, %cst_69 {dimension_numbers = #tpu.dot_dimension_numbers<[1], [0], [0], [1], [0, 0, 1, 1], [], []>} : vector<8x32xbf16>, vector<32x128xbf16>, vector<8x128xf32> -> vector<8x128xf32>
    %c0_70 = arith.constant 0 : index
    %c0_71 = arith.constant 0 : index
    %203 = vector.load %arg14[%c0_70, %c0_71] : memref<1x128xf32, #tpu.memory_space<vmem>>, vector<1x128xf32>
    %204 = vector.shape_cast %203 : vector<1x128xf32> to vector<128xf32>
    %205 = vector.shape_cast %204 : vector<128xf32> to vector<1x128xf32>
    %206 = vector.broadcast %205 : vector<1x128xf32> to vector<8x128xf32>
    %207 = arith.addf %202, %206 : vector<8x128xf32>
    %cst_72 = arith.constant 5.000000e-01 : f32
    %208 = vector.broadcast %cst_72 : f32 to vector<8x128xf32>
    %209 = arith.mulf %208, %207 : vector<8x128xf32>
    %cst_73 = arith.constant 0.707106769 : f32
    %210 = vector.broadcast %cst_73 : f32 to vector<8x128xf32>
    %211 = arith.mulf %207, %210 : vector<8x128xf32>
    %212 = math.erf %211 : vector<8x128xf32>
    %cst_74 = arith.constant 1.000000e+00 : f32
    %213 = vector.broadcast %cst_74 : f32 to vector<8x128xf32>
    %214 = arith.addf %213, %212 : vector<8x128xf32>
    %215 = arith.mulf %209, %214 : vector<8x128xf32>
    %216 = arith.truncf %215 : vector<8x128xf32> to vector<8x128xbf16>
    %c0_75 = arith.constant 0 : index
    %c0_76 = arith.constant 0 : index
    %217 = vector.load %arg15[%c0_75, %c0_76] : memref<128x32xbf16, #tpu.memory_space<vmem>>, vector<128x32xbf16>
    %cst_77 = arith.constant dense<0.000000e+00> : vector<8x32xf32>
    %218 = tpu.matmul %216, %217, %cst_77 {dimension_numbers = #tpu.dot_dimension_numbers<[1], [0], [0], [1], [0, 0, 1, 1], [], []>} : vector<8x128xbf16>, vector<128x32xbf16>, vector<8x32xf32> -> vector<8x32xf32>
    %c0_78 = arith.constant 0 : index
    %c0_79 = arith.constant 0 : index
    %219 = vector.load %arg16[%c0_78, %c0_79] : memref<1x32xf32, #tpu.memory_space<vmem>>, vector<1x32xf32>
    %220 = vector.shape_cast %219 : vector<1x32xf32> to vector<32xf32>
    %221 = vector.shape_cast %220 : vector<32xf32> to vector<1x32xf32>
    %222 = vector.broadcast %221 : vector<1x32xf32> to vector<8x32xf32>
    %223 = arith.addf %218, %222 : vector<8x32xf32>
    %224 = arith.addf %171, %223 : vector<8x32xf32>
    %c0_80 = arith.constant 0 : index
    %c0_81 = arith.constant 0 : index
    %c0_82 = arith.constant 0 : index
    %225 = vector.load %arg17[%c0_80, %c0_81, %c0_82] : memref<1x8x32xf32, #tpu.memory_space<vmem>>, vector<1x8x32xf32>
    %226 = vector.shape_cast %225 : vector<1x8x32xf32> to vector<8x32xf32>
    %227 = vector.shape_cast %224 : vector<8x32xf32> to vector<1x8x32xf32>
    tpu.vector_store %arg17[%c0_80, %c0_81, %c0_82], %227 {strides = array<i32>} : memref<1x8x32xf32, #tpu.memory_space<vmem>>, vector<1x8x32xf32>,
    return
  }
  func.func @transform_0(%arg0: i32, %arg1: i32) -> (i32, i32, i32) {
    %c0_i32 = arith.constant 0 : i32
    %c0_i32_0 = arith.constant 0 : i32
    %c0_i32_1 = arith.constant 0 : i32
    return %arg0, %c0_i32, %c0_i32_0 : i32, i32, i32
  }
  func.func @transform_1(%arg0: i32, %arg1: i32) -> (i32, i32) {
    %c0_i32 = arith.constant 0 : i32
    %c0_i32_0 = arith.constant 0 : i32
    %c0_i32_1 = arith.constant 0 : i32
    return %c0_i32, %c0_i32_0 : i32, i32
  }
  func.func @transform_2(%arg0: i32, %arg1: i32) -> (i32, i32) {
    %c0_i32 = arith.constant 0 : i32
    %c0_i32_0 = arith.constant 0 : i32
    %c0_i32_1 = arith.constant 0 : i32
    return %c0_i32, %c0_i32_0 : i32, i32
  }
  func.func @transform_3(%arg0: i32, %arg1: i32) -> (i32, i32) {
    %c0_i32 = arith.constant 0 : i32
    %c0_i32_0 = arith.constant 0 : i32
    %c0_i32_1 = arith.constant 0 : i32
    return %c0_i32, %c0_i32_0 : i32, i32
  }
  func.func @transform_4(%arg0: i32, %arg1: i32) -> (i32, i32) {
    %c0_i32 = arith.constant 0 : i32
    %c0_i32_0 = arith.constant 0 : i32
    %c0_i32_1 = arith.constant 0 : i32
    return %c0_i32, %c0_i32_0 : i32, i32
  }
  func.func @transform_5(%arg0: i32, %arg1: i32) -> (i32, i32) {
    %c0_i32 = arith.constant 0 : i32
    %c0_i32_0 = arith.constant 0 : i32
    %c0_i32_1 = arith.constant 0 : i32
    return %c0_i32, %c0_i32_0 : i32, i32
  }
  func.func @transform_6(%arg0: i32, %arg1: i32) -> (i32, i32) {
    %c0_i32 = arith.constant 0 : i32
    %c0_i32_0 = arith.constant 0 : i32
    %c0_i32_1 = arith.constant 0 : i32
    return %c0_i32, %c0_i32_0 : i32, i32
  }
  func.func @transform_7(%arg0: i32, %arg1: i32) -> (i32, i32) {
    %c0_i32 = arith.constant 0 : i32
    %c0_i32_0 = arith.constant 0 : i32
    %c0_i32_1 = arith.constant 0 : i32
    return %c0_i32, %c0_i32_0 : i32, i32
  }
  func.func @transform_8(%arg0: i32, %arg1: i32) -> (i32, i32) {
    %c0_i32 = arith.constant 0 : i32
    %c0_i32_0 = arith.constant 0 : i32
    %c0_i32_1 = arith.constant 0 : i32
    return %c0_i32, %c0_i32_0 : i32, i32
  }
  func.func @transform_9(%arg0: i32, %arg1: i32) -> (i32, i32) {
    %c0_i32 = arith.constant 0 : i32
    %c0_i32_0 = arith.constant 0 : i32
    %c0_i32_1 = arith.constant 0 : i32
    return %c0_i32, %c0_i32_0 : i32, i32
  }
  func.func @transform_10(%arg0: i32, %arg1: i32) -> (i32, i32) {
    %c0_i32 = arith.constant 0 : i32
    %c0_i32_0 = arith.constant 0 : i32
    %c0_i32_1 = arith.constant 0 : i32
    return %c0_i32, %c0_i32_0 : i32, i32
  }
  func.func @transform_11(%arg0: i32, %arg1: i32) -> (i32, i32) {
    %c0_i32 = arith.constant 0 : i32
    %c0_i32_0 = arith.constant 0 : i32
    %c0_i32_1 = arith.constant 0 : i32
    return %c0_i32, %c0_i32_0 : i32, i32
  }
  func.func @transform_12(%arg0: i32, %arg1: i32) -> (i32, i32) {
    %c0_i32 = arith.constant 0 : i32
    %c0_i32_0 = arith.constant 0 : i32
    %c0_i32_1 = arith.constant 0 : i32
    return %c0_i32, %c0_i32_0 : i32, i32
  }
  func.func @transform_13(%arg0: i32, %arg1: i32) -> (i32, i32) {
    %c0_i32 = arith.constant 0 : i32
    %c0_i32_0 = arith.constant 0 : i32
    %c0_i32_1 = arith.constant 0 : i32
    return %c0_i32, %c0_i32_0 : i32, i32
  }
  func.func @transform_14(%arg0: i32, %arg1: i32) -> (i32, i32) {
    %c0_i32 = arith.constant 0 : i32
    %c0_i32_0 = arith.constant 0 : i32
    %c0_i32_1 = arith.constant 0 : i32
    return %c0_i32, %c0_i32_0 : i32, i32
  }
  func.func @transform_15(%arg0: i32, %arg1: i32) -> (i32, i32, i32) {
    %c0_i32 = arith.constant 0 : i32
    %c0_i32_0 = arith.constant 0 : i32
    return %arg0, %arg1, %c0_i32 : i32, i32, i32
  }
}

</mosaic_0001>

<bundles_post_ra>
// kernel: tpu_custom_call.1
= control target key start
LH: loop header
LB: loop body
LE: loop exit
PB: predicated region body
PF: predicated region fallthrough
CT: control target
= control target key end

     0   :  { %s2288_s0 = inlined_call_operand.vmem [shape: f32[2,8,32], index: 0, kind: input, shape index: {}]   ;;  %s2289_s1 = inlined_call_operand.vmem [shape: f32[1,32], index: 1, kind: input, shape index: {}]   ;;  %s2290_s2 = inlined_call_operand.vmem [shape: f32[1,32], index: 2, kind: input, shape index: {}]   ;;  %s2291_s3 = inlined_call_operand.vmem [shape: bf16[32,32], index: 3, kind: input, shape index: {}]   ;;  %s2292_s4 = inlined_call_operand.vmem [shape: f32[1,32], index: 4, kind: input, shape index: {}]   ;;  %s2293_s5 = inlined_call_operand.vmem [shape: bf16[32,64], index: 5, kind: input, shape index: {}]   ;;  %s2294_s6 = inlined_call_operand.vmem [shape: f32[1,64], index: 6, kind: input, shape index: {}]   ;;  %s2295_s7 = inlined_call_operand.vmem [shape: bf16[32,32], index: 7, kind: input, shape index: {}]   ;;  %s2296_s8 = inlined_call_operand.vmem [shape: f32[1,32], index: 8, kind: input, shape index: {}]   ;;  %s2297_s9 = inlined_call_operand.vmem [shape: f32[1,32], index: 9, kind: input, shape index: {}]   ;;  %s2298_s10 = inlined_call_operand.vmem [shape: f32[1,32], index: 10, kind: input, shape index: {}]   ;;  %s2299_s11 = inlined_call_operand.vmem [shape: bf16[32,128], index: 11, kind: input, shape index: {}]   ;;  %s2300_s12 = inlined_call_operand.vmem [shape: f32[1,128], index: 12, kind: input, shape index: {}]   ;;  %s2301_s13 = inlined_call_operand.vmem [shape: bf16[128,32], index: 13, kind: input, shape index: {}]   ;;  %s2302_s14 = inlined_call_operand.vmem [shape: f32[1,32], index: 14, kind: input, shape index: {}]   ;;  %s2303_s15 = inlined_call_operand.hbm [shape: f32[2,8,32], index: 15, kind: output, shape index: {}]  }
   0x1   :  { %2306 = sst [smem:[#allocation8_spill]] %s2288_s0 }
   0x2   :  { %2307 = sst [smem:[#allocation9_spill]] %s2289_s1 }
   0x3   :  { %2308 = sst [smem:[#allocation10_spill]] %s2290_s2 }
   0x4   :  { %2309 = sst [smem:[#allocation11_spill]] %s2291_s3 }
   0x5   :  { %20 = vsyncpa [#allocation4], 0 }
   0x6   :  { %22 = vsyncpa [#allocation4 + $0x1], 0  ;;  %s1995_s18 = smov 0   ;;  %s1997_s19 = smov 0  }
   0x7   :  { %s1999_s20 = smov 0   ;;  %s2001_s21 = smov 0  }
   0x8   :  { %s2003_s22 = smov 0   ;;  %s2005_s23 = smov 0  }
   0x9 LB: > { %2310 = sst [smem:[#allocation6_spill]] %s1879_s18  ;;  %s1528_s24 = sadd.s32 4294967295, %s1899_s23   ;;  %s1899_s23 = sphi %s2005_s23, %s28_s23   ;;  %s1895_s22 = sphi %s2003_s22, %s2324_s22   ;;  %s1891_s21 = sphi %s2001_s21, %s2323_s21   ;;  %s1887_s20 = sphi %s1999_s20, %s2322_s20   ;;  %s1883_s19 = sphi %s1997_s19, %s2321_s19   ;;  %s1879_s18 = sphi %s1995_s18, %s2320_s18  }
   0xa   : > { %s1529_s25 = sadd.s32 4294967294, %s1899_s23   ;;  %s40_s26 = sadd.s32 1, %s1895_s22 }
   0xb   : > { %s369_s27 = sadd.s32 1, %s1887_s20  ;;  %p42_p0 = scmp.ge.s32.totalorder %s40_s26, 2 }
   0xc   : > { %p379_p1 = scmp.ne.s32.totalorder %s1887_s20, %s1883_s19  ;;  %p380_p2 = scmp.eq.s32.totalorder %s1528_s24, 1 }
   0xd   : > { %p385_p3 = scmp.ne.s32.totalorder %s1883_s19, %s1879_s18  ;;  %s2326_s26 = smov (%p42_p0, %s40_s26), 0 }
   0xe   : > { %2311 = sst [smem:[#allocation7_spill]] %s2326_s26  ;;  %p2035_p4 = por %p380_p2, %p379_p1 }
   0xf   : > { %p386_p5 = scmp.eq.s32.totalorder %s1529_s25, 1  ;;  %s364_s29 = ssub.s32 %s1895_s22, %s2326_s26 }
  0x10   : > { %p1532_p6 = scmp.ge.s32.totalorder %s1899_s23, 1  ;;  %p367_p7 = scmp.eq.s32.totalorder %s364_s29, 0 }
  0x11   : > { %p2042_p8 = por %p386_p5, %p385_p3  ;;  %p453_p9 = scmp.lt.s32.totalorder %s1899_s23, 3 }
  0x12   : > { %s2048_s16 = scalar_select %p367_p7, %s1887_s20, %s369_s27  }
  0x13   : > { %p454_p10 = pnand %p1532_p6, %p453_p9 }
  0x14   : > { %p500_p11 = scmp.lt.s32.totalorder (!%p454_p10), %s1891_s21, 1  ;;  %vm511_vm0 = vcmask (!%p454_p10), 261120   ;;  %s2314_s0 = sld [smem:[#allocation8_spill]] (!%p454_p10)  ;;  %v1901_v13 = vmov (!%p454_p10), 0.0   ;;  %vm1902_vm1 = vmmov (!%p454_p10), 0   ;;  %v1783_v29 = vld [vmem:[%s2293_s5] sm:$0xff] (!%p454_p10)   ;;  %v692_v60 = vlaneseq (!%p454_p10) }
  0x15   : > { %457 = sbr.rel (%p454_p10) target bundleno = 2613 (0xa35), region = 80  ;;  %s2315_s3 = sld [smem:[#allocation11_spill]] (!%p454_p10)  ;;  %1613 = vmatprep.subr.bf16.mxu1 (!%p454_p10), %v1901_v13  ;;  %1641 = vmatprep.subr.bf16.mxu0 (!%p454_p10), %v1901_v13  ;;  %v1784_v32 = vld [vmem:[%s2293_s5 + $0x8] sm:$0xff] (!%p454_p10)   ;;  %v1537_v35 = vld [vmem:[%s2292_s4] ss:$0 sm:$0xff] (!%p454_p10)  ;;  %vm700_vm2 = vcmask (!%p454_p10), 64512  }
  0x16   : > { %1617 = vmatprep.mubr.msk.bf16.mxu1 (!%p454_p10), %vm1902_vm1, %v1901_v13  ;;  %1643 = vmatprep.mubr.msk.bf16.mxu0 (!%p454_p10), %vm1902_vm1, %v1901_v13  ;;  %s2316_s1 = sld [smem:[#allocation9_spill]] (!%p454_p10)  ;;  %s2317_s2 = sld [smem:[#allocation10_spill]] (!%p454_p10)  ;;  %v1541_v43 = vld [vmem:[%s2294_s6] ss:$0 sm:$0xff] (!%p454_p10)  ;;  %v693_v61 = vshrl.u32 (!%p454_p10), %v692_v60, 7  ;;  %v697_v62 = vand.u32 (!%p454_p10), 127, %v692_v60 }
  0x17   : > { %s1903_s27 = smov (!%p454_p10), 120   ;;  %s1904_s29 = smov (!%p454_p10), 112   ;;  %v1906_v63 = vmov (!%p454_p10), -1e+30   ;;  %vm765_vm4 = vcmask (!%p454_p10), 1043456   ;;  %vm925_vm5 = vcmask (!%p454_p10), 130112  }
  0x18   : > { %vm698_vm3 = vcmp.le.s32.totalorder (!%p454_p10), %v697_v62, %v693_v61  ;;  %s1908_s25 = smov (!%p454_p10), 80   ;;  %s1909_s18 = smov (!%p454_p10), 96   ;;  %vm1041_vm6 = vcmask (!%p454_p10), 195712   ;;  %vm1157_vm7 = vcmask (!%p454_p10), 261312  }
  0x1b   : > { %v1781_v12 = vld [vmem:[%s2315_s3] sm:$0xff] (!%p454_p10)   ;;  %v1782_v14 = vld [vmem:[%s2315_s3 + $0x8] sm:$0xff] (!%p454_p10)  }
  0x1c   : > { %s501_s17 = scalar_select %p500_p11, %s1891_s21, 1  ;;  %1614 = vmatpush3.bf16.msra.mxu1 %v1781_v12  ;;  %v1535_v22 = vld [vmem:[%s2316_s1] ss:$0 sm:$0xff] }
  0x1d   : > { %1615 = vmatprep.subr.bf16.mxu1 %v1901_v13  ;;  %v1536_v24 = vld [vmem:[%s2317_s2] ss:$0 sm:$0xff] }
  0x1e   : > { %s1534_s24 = sshll.u32 %s501_s17, 3  ;;  %s1905_s17 = smov 104  }
  0x1f   : > { %s503_s26 = scalar_lea.vmem %s2314_s0, %s1534_s24  ;;  %s1907_s24 = smov 88  }
  0x20   : > { %v2055_v0 = vld [vmem:[%s503_s26] sm:$0xff]  ;;  %1616 = vmatpush3.bf16.msra.mxu1 %v1782_v14  ;;  %s1910_s26 = smov 72  }
  0x21   : > { %v541_v1 = vsel %vm511_vm0, %v2055_v0, 0.0  ;;  %1621 = vmatprep.subr.bf16.mxu1 %v1901_v13 }
  0x22   : > { %542 = vadd.xlane.f32.xlu0 %v541_v1 }
  0x26   : > { %513 = vadd.xlane.f32.xlu0 %v541_v1  ;;  %v699_v1 = vsel %vm698_vm3, 0.0, %v1906_v63 }
  0xaf   : > { %v543_v2 = vpop.xlane.xlu0 %542 }
  0xb0   : > { %v544_v3 = vmul.f32 0.03125, %v543_v2 }
  0xb2   : > { %v545_v4 = vsub.f32 %v2055_v0, %v544_v3 }
  0xb3   : > { %v514_v5 = vpop.xlane.xlu0 %513 }
  0xb4   : > { %v516_v6 = vmul.f32 0.03125, %v514_v5  ;;  %v546_v7 = vmul.f32 %v545_v4, %v545_v4 }
  0xb6   : > { %v517_v8 = vsub.f32 %v2055_v0, %v516_v6  ;;  %v547_v9 = vsel %vm511_vm0, %v546_v7, 0.0 }
  0xb7   : > { %548 = vadd.xlane.f32.xlu1 %v547_v9 }
  0xb8   : > { %v518_v10 = vmul.f32 %v517_v8, %v517_v8 }
  0xba   : > { %v519_v11 = vsel %vm511_vm0, %v518_v10, 0.0 }
  0xbb   : > { %520 = vadd.xlane.f32.xlu1 %v519_v11 }
 0x144   : > { %v549_v15 = vpop.xlane.xlu1 %548 }
 0x145   : > { %v550_v16 = vmul.f32 0.03125, %v549_v15 }
 0x147   : > { %v551_v17 = vadd.f32 1e-05, %v550_v16 }
 0x148   : > { %v521_v18 = vpop.xlane.xlu1 %520 }
 0x149   : > { %1797 = vrsqrt.f32 %v551_v17  ;;  %v522_v19 = vmul.f32 0.03125, %v521_v18 }
 0x14b   : > { %v523_v20 = vadd.f32 1e-05, %v522_v19 }
 0x14d   : > { %1799 = vrsqrt.f32 %v523_v20 }
 0x153   : > { %v1798_v21 = vpop.eup %1797 }
 0x154   : > { %v553_v23 = vmul.f32 %v1798_v21, %v545_v4 }
 0x156   : > { %v554_v25 = vmul.f32 %v1535_v22, %v553_v23 }
 0x157   : > { %v1800_v26 = vpop.eup %1799 }
 0x158   : > { %v525_v27 = vmul.f32 %v1800_v26, %v517_v8  ;;  %v555_v28 = vadd.f32 %v1536_v24, %v554_v25 }
 0x15a   : > { %v532_v30 = vmul.f32 %v1535_v22, %v525_v27  ;;  %v556_v31 = vpack.c.bf16 %v555_v28, %v555_v28 }
 0x15c   : > { %1618 = vmatmul.mubr.msk.bf16.vlgmr.msra.gmra.mrb[0].mxu1 %vm511_vm0, %v556_v31  ;;  %v539_v33 = vadd.f32 %v1536_v24, %v532_v30 }
 0x15d   : > { %1622 = vmatpush3.bf16.msra.mxu1 %v1783_v29  ;;  %1625 = vmatprep.mubr.msk.bf16.mxu1 %vm1902_vm1, %v1901_v13 }
 0x15e   : > { %1623 = vmatprep.subr.bf16.mxu1 %v1901_v13  ;;  %v540_v34 = vpack.c.bf16 %v539_v33, %v539_v33 }
 0x161   : > { %1624 = vmatpush3.bf16.msra.mxu1 %v1784_v32 }
 0x162   : > { %1629 = vmatprep.subr.bf16.mxu1 %v1901_v13 }
 0x164   : > { %1626 = vmatmul.mubr.msk.bf16.vlgmr.msra.gmra.mrb[4].mxu1 %vm511_vm0, %v540_v34 }
 0x165   : > { %1631 = vmatprep.mubr.msk.bf16.mxu1 %vm1902_vm1, %v1901_v13 }
 0x22f   : > { %v617_v36 = vpop.f32.mrb[0].mxu1 }
 0x230   : > { %v618_v37 = vadd.f32 %v1537_v35, %v617_v36  ;;  %v1619_v38 = vpop.f32.mrb[1].mxu1 }
 0x231   : > { %v620_v39 = vpop.f32.mrb[2].mxu1 }
 0x232   : > { %v623_v40 = vmul.f32 0.35355338, %v618_v37  ;;  %v1620_v41 = vpop.f32.mrb[3].mxu1 }
 0x234   : > { %v690_v42 = vpack.c.bf16 %v623_v40, %v623_v40 }
 0x236   : > { %811 = vrot.lane.b32.xlu1 %v690_v42, %s1903_s27 }
 0x237   : > { %v684_v44 = vpop.f32.mrb[4].mxu1 }
 0x238   : > { %v685_v45 = vadd.f32 %v1541_v43, %v684_v44  ;;  %v1627_v46 = vpop.f32.mrb[5].mxu1 }
 0x239   : > { %v687_v47 = vpop.f32.mrb[6].mxu1 }
 0x23a   : > { %v2103_v48 = vpack.c.bf16 %v685_v45, %v685_v45  ;;  %v1628_v49 = vpop.f32.mrb[7].mxu1 }
 0x23c   : > { %929 = vrot.lane.b32.xlu1 %v2103_v48, %s1904_s29  ;;  %813 = vrot.lane.b32.xlu0 %v2103_v48, %s1903_s27  ;;  %v705_v50 = vsel %vm700_vm2, %v2103_v48, 0  ;;  %s1911_s27 = smov 8  }
 0x23d   : > { %1630 = vmatpush3.bf16.xpose.msra.mxu1 %v705_v50 }
 0x23e   : > { %1635 = vmatprep.subr.bf16.mxu1 %v1901_v13 }
 0x240   : > { %927 = vrot.lane.b32.xlu1 %v690_v42, %s1904_s29  ;;  %1045 = vrot.lane.b32.xlu0 %v2103_v48, %s1905_s17  ;;  %s1912_s29 = smov 16  }
 0x244   : > { %1043 = vrot.lane.b32.xlu1 %v690_v42, %s1905_s17  ;;  %1632 = vmatmul.mubr.msk.bf16.vlgmr.msra.gmra.mrb[8].mxu1 %vm700_vm2, %v690_v42 }
 0x245   : > { %1637 = vmatprep.mubr.msk.bf16.mxu1 %vm1902_vm1, %v1901_v13 }
 0x2a8   : > { %v812_v53 = vpop.permute.xlu1 %811 }
 0x2ae   : > { %v814_v51 = vpop.permute.xlu0 %813  ;;  %v930_v54 = vpop.permute.xlu1 %929 }
 0x2af   : > { %v819_v52 = vsel %vm700_vm2, %v814_v51, 0  ;;  %v935_v55 = vsel %vm700_vm2, %v930_v54, 0 }
 0x2b0   : > { %1642 = vmatpush3.bf16.xpose.msra.mxu0 %v819_v52 }
 0x2b1   : > { %1653 = vmatprep.subr.bf16.mxu0 %v1901_v13 }
 0x2b2   : > { %v1046_v56 = vpop.permute.xlu0 %1045  ;;  %v928_v57 = vpop.permute.xlu1 %927 }
 0x2b3   : > { %v1051_v58 = vsel %vm700_vm2, %v1046_v56, 0 }
 0x2b6   : > { %v1044_v59 = vpop.permute.xlu1 %1043 }
 0x2b7   : > { %1644 = vmatmul.mubr.msk.bf16.vlgmr.msra.gmra.mrb[0].mxu0 %vm700_vm2, %v812_v53 }
 0x2b8   : > { %1654 = vmatpush3.bf16.xpose.msra.mxu0 %v935_v55  ;;  %1655 = vmatprep.mubr.msk.bf16.mxu0 %vm1902_vm1, %v1901_v13 }
 0x2b9   : > { %1665 = vmatprep.subr.bf16.mxu0 %v1901_v13 }
 0x2bf   : > { %1656 = vmatmul.mubr.msk.bf16.vlgmr.msra.gmra.mrb[4].mxu0 %vm700_vm2, %v928_v57 }
 0x2c0   : > { %1666 = vmatpush3.bf16.xpose.msra.mxu0 %v1051_v58  ;;  %1667 = vmatprep.mubr.msk.bf16.mxu0 %vm1902_vm1, %v1901_v13 }
 0x2c1   : > { %1677 = vmatprep.subr.bf16.mxu0 %v1901_v13 }
 0x2c7   : > { %1668 = vmatmul.mubr.msk.bf16.vlgmr.msra.gmra.mrb[8].mxu0 %vm700_vm2, %v1044_v59 }
 0x2c8   : > { %1681 = vmatprep.mubr.msk.bf16.mxu0 %vm1902_vm1, %v1901_v13 }
 0x317   : > { %v741_v2 = vpop.f32.mrb[8].mxu1 }
 0x318   : > { %v742_v3 = vadd.f32 %v741_v2, %v699_v1  ;;  %v1633_v4 = vpop.f32.mrb[9].mxu1 }
 0x319   : > { %v744_v5 = vpop.f32.mrb[10].mxu1 }
 0x31a   : > { %v1634_v6 = vpop.f32.mrb[11].mxu1  ;;  %v747_v7 = vsel %vm700_vm2, %v742_v3, -inf }
 0x31b   : > { %748 = vmax.xlane.f32.xlu0 %v747_v7 }
 0x38a   : > { %v855_v8 = vpop.f32.mrb[0].mxu0 }
 0x38b   : > { %v856_v9 = vadd.f32 %v855_v8, %v699_v1  ;;  %v1645_v10 = vpop.f32.mrb[1].mxu0 }
 0x38c   : > { %v858_v11 = vpop.f32.mrb[2].mxu0 }
 0x38d   : > { %v1646_v12 = vpop.f32.mrb[3].mxu0  ;;  %v861_v14 = vsel %vm700_vm2, %v856_v9, -inf }
 0x38e   : > { %862 = vmax.xlane.f32.xlu1 %v861_v14 }
 0x392   : > { %v971_v15 = vpop.f32.mrb[4].mxu0 }
 0x393   : > { %v972_v16 = vadd.f32 %v971_v15, %v699_v1  ;;  %v1657_v17 = vpop.f32.mrb[5].mxu0 }
 0x394   : > { %v974_v18 = vpop.f32.mrb[6].mxu0 }
 0x395   : > { %v1658_v19 = vpop.f32.mrb[7].mxu0  ;;  %v977_v20 = vsel %vm700_vm2, %v972_v16, -inf }
 0x396   : > { %978 = vmax.xlane.f32.xlu0 %v977_v20 }
 0x39a   : > { %v1087_v21 = vpop.f32.mrb[8].mxu0 }
 0x39b   : > { %v1088_v22 = vadd.f32 %v1087_v21, %v699_v1  ;;  %v1669_v23 = vpop.f32.mrb[9].mxu0  ;;  %v1785_v21 = vld [vmem:[%s2295_s7] sm:$0xff]  }
 0x39c   : > { %v1090_v24 = vpop.f32.mrb[10].mxu0  ;;  %1678 = vmatpush3.bf16.msra.mxu0 %v1785_v21 }
 0x39d   : > { %v1670_v25 = vpop.f32.mrb[11].mxu0  ;;  %v1093_v26 = vsel %vm700_vm2, %v1088_v22, -inf  ;;  %1679 = vmatprep.subr.bf16.mxu0 %v1901_v13 }
 0x39e   : > { %1094 = vmax.xlane.f32.xlu0 %v1093_v26 }
 0x3a8   : > { %v749_v27 = vpop.xlane.xlu0 %748 }
 0x3a9   : > { %v750_v28 = vsub.f32 %v742_v3, %v749_v27 }
 0x3ab   : > { %v751_v29 = vmul.f32 1.442695, %v750_v28 }
 0x3ad   : > { %1801 = vpow2.f32 %v751_v29 }
 0x3b7   : > { %v1802_v30 = vpop.eup %1801 }
 0x3b8   : > { %v753_v31 = vsel %vm700_vm2, %v1802_v30, 0.0 }
 0x3b9   : > { %754 = vadd.xlane.f32.xlu0 %v753_v31 }
 0x41b   : > { %v863_v32 = vpop.xlane.xlu1 %862 }
 0x41c   : > { %v864_v33 = vsub.f32 %v856_v9, %v863_v32  ;;  %v1553_v32 = vld [vmem:[%s2296_s8] ss:$0 sm:$0xff] }
 0x41e   : > { %v865_v34 = vmul.f32 1.442695, %v864_v33 }
 0x420   : > { %1803 = vpow2.f32 %v865_v34 }
 0x423   : > { %v979_v35 = vpop.xlane.xlu0 %978 }
 0x424   : > { %v980_v36 = vsub.f32 %v972_v16, %v979_v35 }
 0x426   : > { %v981_v37 = vmul.f32 1.442695, %v980_v36 }
 0x428   : > { %1805 = vpow2.f32 %v981_v37 }
 0x42a   : > { %v1804_v38 = vpop.eup %1803 }
 0x42b   : > { %v867_v39 = vsel %vm700_vm2, %v1804_v38, 0.0  ;;  %v1095_v42 = vpop.xlane.xlu0 %1094 }
 0x42c   : > { %868 = vadd.xlane.f32.xlu1 %v867_v39  ;;  %v1096_v43 = vsub.f32 %v1088_v22, %v1095_v42  ;;  %v1786_v22 = vld [vmem:[%s2295_s7 + $0x8] sm:$0xff]  }
 0x42d   : > { %1680 = vmatpush3.bf16.msra.mxu0 %v1786_v22 }
 0x42e   : > { %v1097_v44 = vmul.f32 1.442695, %v1096_v43  ;;  %1693 = vmatprep.subr.bf16.mxu0 %v1901_v13 }
 0x430   : > { %1807 = vpow2.f32 %v1097_v44 }
 0x432   : > { %v1806_v40 = vpop.eup %1805 }
 0x433   : > { %v983_v41 = vsel %vm700_vm2, %v1806_v40, 0.0 }
 0x434   : > { %984 = vadd.xlane.f32.xlu0 %v983_v41 }
 0x43a   : > { %v1808_v45 = vpop.eup %1807 }
 0x43b   : > { %v1099_v46 = vsel %vm700_vm2, %v1808_v45, 0.0 }
 0x43d   : > { %873 = vrot.lane.b32.xlu1 %v2103_v48, %s1907_s24 }
 0x441   : > { %989 = vrot.lane.b32.xlu1 %v2103_v48, %s1908_s25  ;;  %s497_s25 = sand.u32 1, %s1883_s19  }
 0x442   : > { %s1533_s0 = sshll.u32 %s497_s25, 3 }
 0x446   : > { %v755_v47 = vpop.xlane.xlu0 %754 }
 0x447   : > { %1809 = vrcp.f32 %v755_v47  ;;  %v1790_v47 = vld [vmem:[%s2301_s13 + $0x8] sm:$0xff]  }
 0x44a   : > { %760 = vrot.lane.b32.xlu0 %v2103_v48, %s1909_s18  ;;  %s1914_s18 = smov [#allocation3]  }
 0x451   : > { %v1810_v50 = vpop.eup %1809 }
 0x452   : > { %v757_v52 = vmul.f32 %v1810_v50, %v1802_v30 }
 0x454   : > { %v758_v56 = vpack.c.bf16 %v757_v52, %v757_v52 }
 0x465   : > { %1100 = vadd.xlane.f32.xlu1 %v1099_v46  ;;  %v1789_v46 = vld [vmem:[%s2301_s13] sm:$0xff]  }
 0x476   : > { %1105 = vrot.lane.b32.xlu1 %v2103_v48, %s1910_s26  ;;  %s1913_s26 = smov 24  }
 0x4b9   : > { %v869_v49 = vpop.xlane.xlu1 %868 }
 0x4ba   : > { %1811 = vrcp.f32 %v869_v49  ;;  %v1791_v49 = vld [vmem:[%s2301_s13 + $0x10] sm:$0xff]  }
 0x4bd   : > { %v874_v55 = vpop.permute.xlu1 %873 }
 0x4be   : > { %v879_v48 = vsel %vm765_vm4, %v874_v55, 0 }
 0x4c1   : > { %v985_v51 = vpop.xlane.xlu0 %984  ;;  %v990_v59 = vpop.permute.xlu1 %989 }
 0x4c2   : > { %1813 = vrcp.f32 %v985_v51  ;;  %v995_v62 = vsel %vm765_vm4, %v990_v59, 0  ;;  %v1792_v59 = vld [vmem:[%s2301_s13 + $0x18] sm:$0xff]  }
 0x4c4   : > { %v1812_v57 = vpop.eup %1811 }
 0x4c5   : > { %v761_v53 = vpop.permute.xlu0 %760  ;;  %v871_v58 = vmul.f32 %v1812_v57, %v1804_v38 }
 0x4c6   : > { %v767_v54 = vsel %vm765_vm4, %v761_v53, 0 }
 0x4c7   : > { %1636 = vmatpush3.bf16.msra.mxu1 %v767_v54  ;;  %v872_v60 = vpack.c.bf16 %v871_v58, %v871_v58  ;;  %v1557_v54 = vld [vmem:[%s2297_s9] ss:$0 sm:$0xff] }
 0x4c8   : > { %1647 = vmatprep.subr.bf16.mxu1 %v1901_v13 }
 0x4ca   : > { %1638 = vmatmul.mubr.msk.bf16.vlgmr.msra.gmra.mrb[12].mxu1 %vm700_vm2, %v758_v56  ;;  %v1558_v56 = vld [vmem:[%s2298_s10] ss:$0 sm:$0xff] }
 0x4cb   : > { %1648 = vmatpush3.bf16.msra.mxu1 %v879_v48  ;;  %1649 = vmatprep.mubr.msk.bf16.mxu1 %vm1902_vm1, %v1901_v13 }
 0x4cc   : > { %1659 = vmatprep.subr.bf16.mxu1 %v1901_v13  ;;  %v1814_v61 = vpop.eup %1813 }
 0x4cd   : > { %v987_v63 = vmul.f32 %v1814_v61, %v1806_v40  ;;  %v1794_v61 = vld [vmem:[%s2301_s13 + $0x28] sm:$0xff]  }
 0x4cf   : > { %v988_v1 = vpack.c.bf16 %v987_v63, %v987_v63  ;;  %v1796_v63 = vld [vmem:[%s2301_s13 + $0x38] sm:$0xff]  }
 0x4d2   : > { %1650 = vmatmul.mubr.msk.bf16.vlgmr.msra.gmra.mrb[16].mxu1 %vm700_vm2, %v872_v60  ;;  %v1793_v60 = vld [vmem:[%s2301_s13 + $0x20] sm:$0xff]  }
 0x4d3   : > { %1660 = vmatpush3.bf16.msra.mxu1 %v995_v62  ;;  %1661 = vmatprep.mubr.msk.bf16.mxu1 %vm1902_vm1, %v1901_v13  ;;  %v1795_v62 = vld [vmem:[%s2301_s13 + $0x30] sm:$0xff]  }
 0x4d4   : > { %1671 = vmatprep.subr.bf16.mxu1 %v1901_v13 }
 0x4da   : > { %1662 = vmatmul.mubr.msk.bf16.vlgmr.msra.gmra.mrb[20].mxu1 %vm700_vm2, %v988_v1  ;;  %v1559_v1 = vld [vmem:[%s2300_s12] ss:$0 sm:$0xff] }
 0x4db   : > { %1673 = vmatprep.mubr.msk.bf16.mxu1 %vm1902_vm1, %v1901_v13 }
 0x4f2   : > { %v1101_v2 = vpop.xlane.xlu1 %1100 }
 0x4f3   : > { %1815 = vrcp.f32 %v1101_v2 }
 0x4f6   : > { %v1106_v3 = vpop.permute.xlu1 %1105 }
 0x4f7   : > { %v1111_v4 = vsel %vm765_vm4, %v1106_v3, 0 }
 0x4f8   : > { %1672 = vmatpush3.bf16.msra.mxu1 %v1111_v4 }
 0x4f9   : > { %1685 = vmatprep.subr.bf16.mxu1 %v1901_v13 }
 0x4fd   : > { %v1816_v5 = vpop.eup %1815 }
 0x4fe   : > { %v1103_v6 = vmul.f32 %v1816_v5, %v1808_v45  ;;  %v1787_v45 = vld [vmem:[%s2299_s11] sm:$0xff]  }
 0x500   : > { %v1104_v7 = vpack.c.bf16 %v1103_v6, %v1103_v6 }
 0x502   : > { %1674 = vmatmul.mubr.msk.bf16.vlgmr.msra.gmra.mrb[24].mxu1 %vm700_vm2, %v1104_v7 }
 0x503   : > { %1689 = vmatprep.mubr.msk.bf16.mxu1 %vm1902_vm1, %v1901_v13  ;;  %1686 = vmatpush3.bf16.msra.mxu1 %v1787_v45 }
 0x504   : > { %1687 = vmatprep.subr.bf16.mxu1 %v1901_v13 }
 0x59d   : > { %v803_v8 = vpop.f32.mrb[12].mxu1 }
 0x59e   : > { %809 = vst.msk [vmem:[#allocation2] sm:$0xff] %vm700_vm2, %v803_v8  ;;  %v1639_v9 = vpop.f32.mrb[13].mxu1 }
 0x59f   : > { %v806_v10 = vpop.f32.mrb[14].mxu1 }
 0x5a0   : > { %v1640_v11 = vpop.f32.mrb[15].mxu1 }
 0x5a5   : > { %v915_v12 = vpop.f32.mrb[16].mxu1 }
 0x5a6   : > { %922 = vrot.lane.b32.xlu0 %v915_v12, %s1911_s27  ;;  %v1651_v14 = vpop.f32.mrb[17].mxu1  ;;  %v1563_v12 = vld [vmem:[%s2302_s14] ss:$0 sm:$0xff]  ;;  %s1573_s27 = sshll.u32 %s1891_s21, 7  ;;  %s1444_s21 = scalar_lea.sflag [#allocation4], %s497_s25 }
 0x5a7   : > { %v918_v15 = vpop.f32.mrb[18].mxu1  ;;  %s2240_s2 = scalar_lea.hbm %s2303_s15, %s1573_s27 }
 0x5a8   : > { %v1652_v16 = vpop.f32.mrb[19].mxu1 }
 0x5ad   : > { %v1031_v17 = vpop.f32.mrb[20].mxu1 }
 0x5ae   : > { %1038 = vrot.lane.b32.xlu1 %v1031_v17, %s1912_s29  ;;  %v1663_v18 = vpop.f32.mrb[21].mxu1  ;;  %s499_s29 = scalar_lea.vmem [#allocation3], %s1533_s0 }
 0x5af   : > { %v1034_v19 = vpop.f32.mrb[22].mxu1  ;;  %s1458_s17 = sshll.u32 %s499_s29, 4  ;;  %s2242_s17 = int_to_ptr.vmem [resolvable:$true] %s1458_s17 }
 0x5b0   : > { %v1664_v20 = vpop.f32.mrb[23].mxu1  ;;  %s1821_s0 = scalar_lea.vmem %s2242_s17, 128 }
 0x5b1   : > { %p1822_p12 = scmp.ne.s32.totalorder %s2242_s17, %s1821_s0 }
 0x5b3   : > { %p1823_p13 = pnand %p1822_p12, %p2035_p4 }
 0x5b5   : > { %p1824_p0 = pneg %p1823_p13 }
 0x5d5   : > { %v1147_v23 = vpop.f32.mrb[24].mxu1 }
 0x5d6   : > { %1154 = vrot.lane.b32.xlu0 %v1147_v23, %s1913_s26  ;;  %v1675_v24 = vpop.f32.mrb[25].mxu1  ;;  %s1825_s26 = sshll.u32 %s1914_s18, 4  ;;  %s1826_s26 = int_to_ptr.vmem [resolvable:$false] %s1825_s26 }
 0x5d7   : > { %v1150_v25 = vpop.f32.mrb[26].mxu1  ;;  %s1827_s3 = scalar_lea.vmem %s1826_s26, 256  ;;  %p1828_p1 = scmp.lt.s32.totalorder %s2242_s17, %s1826_s26 }
 0x5d8   : > { %v1676_v26 = vpop.f32.mrb[27].mxu1  ;;  %p1829_p2 = scmp.lt.s32.totalorder %s1827_s3, %s1821_s0 }
 0x5da   : > { %p1830_p3 = por %p1829_p2, %p1828_p1 }
 0x5dc   : > { %p1831_p5 = pnand %p1830_p3, %p1824_p0 }
 0x618   : > { %v923_v27 = vpop.permute.xlu0 %922 }
 0x619   : > { %926 = vst.msk [vmem:[#allocation2] sm:$0xff] %vm925_vm5, %v923_v27 }
 0x620   : > { %v1039_v28 = vpop.permute.xlu1 %1038 }
 0x621   : > { %1042 = vst.msk [vmem:[#allocation2] sm:$0xff] %vm1041_vm6, %v1039_v28 }
 0x648   : > { %v1155_v29 = vpop.permute.xlu0 %1154 }
 0x649   : > { %1158 = vst.msk [vmem:[#allocation2] sm:$0xff] %vm1157_vm7, %v1155_v29 }
 0x650   : > { %v1159_v30 = vld [vmem:[#allocation2] sm:$0xff] }
 0x651   : > { %v1160_v31 = vpack.c.bf16 %v1159_v30, %v1159_v30 }
 0x653   : > { %1682 = vmatmul.mubr.msk.bf16.vlgmr.msra.gmra.mrb[12].mxu0 %vm511_vm0, %v1160_v31 }
 0x654   : > { %1709 = vmatprep.mubr.msk.bf16.mxu0 %vm1902_vm1, %v1901_v13  ;;  %1694 = vmatpush3.bf16.msra.mxu0 %v1789_v46 }
 0x655   : > { %1695 = vmatprep.subr.bf16.mxu0 %v1901_v13 }
 0x658   : > { %1696 = vmatpush3.bf16.msra.mxu0 %v1790_v47 }
 0x659   : > { %1697 = vmatprep.subr.bf16.mxu0 %v1901_v13 }
 0x65c   : > { %1698 = vmatpush3.bf16.msra.mxu0 %v1791_v49 }
 0x65d   : > { %1699 = vmatprep.subr.bf16.mxu0 %v1901_v13 }
 0x660   : > { %1700 = vmatpush3.bf16.msra.mxu0 %v1792_v59 }
 0x661   : > { %1701 = vmatprep.subr.bf16.mxu0 %v1901_v13 }
 0x664   : > { %1702 = vmatpush3.bf16.msra.mxu0 %v1793_v60 }
 0x665   : > { %1703 = vmatprep.subr.bf16.mxu0 %v1901_v13 }
 0x668   : > { %1704 = vmatpush3.bf16.msra.mxu0 %v1794_v61 }
 0x669   : > { %1705 = vmatprep.subr.bf16.mxu0 %v1901_v13 }
 0x66c   : > { %1706 = vmatpush3.bf16.msra.mxu0 %v1795_v62 }
 0x66d   : > { %1707 = vmatprep.subr.bf16.mxu0 %v1901_v13 }
 0x670   : > { %1708 = vmatpush3.bf16.msra.mxu0 %v1796_v63 }
 0x726   : > { %v1221_v33 = vpop.f32.mrb[12].mxu0 }
 0x727   : > { %v1222_v34 = vadd.f32 %v1553_v32, %v1221_v33  ;;  %v1683_v35 = vpop.f32.mrb[13].mxu0 }
 0x728   : > { %v1224_v36 = vpop.f32.mrb[14].mxu0 }
 0x729   : > { %v2177_v37 = vadd.f32 %v1222_v34, %v2055_v0  ;;  %v1684_v38 = vpop.f32.mrb[15].mxu0  ;;  %v1788_v0 = vld [vmem:[%s2299_s11 + $0x8] sm:$0xff]  }
 0x72a   : > { %1688 = vmatpush3.bf16.msra.mxu1 %v1788_v0 }
 0x72b   : > { %v1230_v39 = vsel %vm511_vm0, %v2177_v37, 0.0 }
 0x72c   : > { %1231 = vadd.xlane.f32.xlu1 %v1230_v39 }
 0x7b9   : > { %v1232_v40 = vpop.xlane.xlu1 %1231 }
 0x7ba   : > { %v1233_v41 = vmul.f32 0.03125, %v1232_v40 }
 0x7bc   : > { %v1234_v42 = vsub.f32 %v2177_v37, %v1233_v41 }
 0x7be   : > { %v1235_v43 = vmul.f32 %v1234_v42, %v1234_v42 }
 0x7c0   : > { %v1236_v44 = vsel %vm511_vm0, %v1235_v43, 0.0 }
 0x7c1   : > { %1237 = vadd.xlane.f32.xlu0 %v1236_v44 }
 0x84e   : > { %v1238_v50 = vpop.xlane.xlu0 %1237 }
 0x84f   : > { %v1239_v51 = vmul.f32 0.03125, %v1238_v50 }
 0x851   : > { %v1240_v52 = vadd.f32 1e-05, %v1239_v51 }
 0x853   : > { %1817 = vrsqrt.f32 %v1240_v52 }
 0x85d   : > { %v1818_v53 = vpop.eup %1817 }
 0x85e   : > { %v1242_v55 = vmul.f32 %v1818_v53, %v1234_v42 }
 0x860   : > { %v1249_v57 = vmul.f32 %v1557_v54, %v1242_v55 }
 0x862   : > { %v1256_v48 = vadd.f32 %v1558_v56, %v1249_v57 }
 0x864   : > { %v1257_v58 = vpack.c.bf16 %v1256_v48, %v1256_v48 }
 0x866   : > { %1690 = vmatmul.mubr.msk.bf16.vlgmr.msra.gmra.mrb[28].mxu1 %vm511_vm0, %v1257_v58 }
 0x939   : > { %v1318_v2 = vpop.f32.mrb[28].mxu1 }
 0x93a   : > { %v1319_v3 = vadd.f32 %v1559_v1, %v1318_v2  ;;  %v1691_v4 = vpop.f32.mrb[29].mxu1 }
 0x93b   : > { %v1321_v5 = vpop.f32.mrb[30].mxu1 }
 0x93c   : > { %v1325_v6 = vmul.f32 0.70710677, %v1319_v3  ;;  %v1692_v7 = vpop.f32.mrb[31].mxu1  ;;  %v1324_v13 = vmul.f32 0.5, %v1319_v3 }
 0x93e   : > { %1819 = verf.f32 %v1325_v6 }
 0x948   : > { %v1820_v8 = vpop.eup %1819 }
 0x949   : > { %v1327_v9 = vadd.f32 1.0, %v1820_v8 }
 0x94b   : > { %v1328_v10 = vmul.f32 %v1327_v9, %v1324_v13 }
 0x94d   : > { %v1329_v11 = vpack.c.bf16 %v1328_v10, %v1328_v10 }
 0x94f   : > { %1710 = vmatmul.mubr.bf16.vlgmr.msra.gmra.mrb[16].mxu0 %v1329_v11 }
 0xa22   : > { %v1435_v14 = vpop.f32.mrb[16].mxu0 }
 0xa23   : > { %v1436_v15 = vadd.f32 %v1563_v12, %v1435_v14  ;;  %v1711_v16 = vpop.f32.mrb[17].mxu0 }
 0xa24   : > { %v1438_v17 = vpop.f32.mrb[18].mxu0 }
 0xa25   : > { %v1441_v18 = vadd.f32 %v1436_v15, %v2177_v37  ;;  %v1712_v19 = vpop.f32.mrb[19].mxu0 }
 0xa27   : > { %1442 = vst.msk [vmem:[%s499_s29] sm:$0xff] %vm511_vm0, %v1441_v18 }
 0xa28   : > { %1834 = shalt.err (!%p1831_p5)
}
 0xa29   : > { %s1835_s1 = scalar_lea.hbm %s2240_s2, 128  ;;  %s1839_s29 = scalar_lea.hbm %s2303_s15, 256 }
 0xa2a   : > { %p1836_p6 = scmp.ne.s32.totalorder %s2240_s2, %s1835_s1  ;;  %p1840_p10 = scmp.lt.u32.totalorder %s2240_s2, %s2303_s15 }
 0xa2b   : > { %p1841_p11 = scmp.lt.u32.totalorder %s1839_s29, %s1835_s1  ;;  %p1843_p13 = scmp.lt.u32.totalorder %s1835_s1, %s2240_s2 }
 0xa2c   : > { %p1837_p7 = pnand %p1836_p6, %p2035_p4 }
 0xa2d   : > { %p1842_p12 = por %p1841_p11, %p1840_p10 }
 0xa2e   : > { %p1838_p9 = pneg %p1837_p7 }
 0xa2f   : > { %p1844_p0 = por %p1843_p13, %p1842_p12 }
 0xa31   : > { %p1845_p1 = pnand %p1844_p0, %p1838_p9 }
 0xa33   : > { %1848 = shalt.err (!%p1845_p1)
}
 0xa34   : > { %1713 = dma.vmem_to_hbm [thread:$0]  (%p2035_p4), %s2242_s17, 128, %s2240_s2, %s1444_s21  }
 0xa35 PF: > { %s2318_s3 = sld [smem:[#allocation6_spill]]  ;;  %p1719_p2 = scmp.ge.s32.totalorder %s1899_s23, 2 }
 0xa37   : > { %p1716_p3 = pnand %p1719_p2, %p2042_p8 }
 0xa3b   : > { %s1470_s0 = sand.u32 1, %s2318_s3  }
 0xa3c   : > { %s1471_s26 = scalar_lea.sflag [#allocation4], %s1470_s0 }
 0xa3d   : > { %1874 = dma.done.wait (!%p1716_p3), %s1471_s26, 128  }
 0xa3e   : > { %1876 = vsyncadd (!%p1716_p3), %s1471_s26, 4294967168  ;;  %s28_s23 = sadd.s32 1, %s1899_s23   ;;  %s2319_s28 = sld [smem:[#allocation7_spill]] }
 0xa3f   : > { %p25_p5 = scmp.ge.s32.totalorder %s28_s23, 4   ;;  %s2320_s18 = smov %s1883_s19 }
 0xa40   : > { %s2321_s19 = smov %s1887_s20  ;;  %s2322_s20 = smov %s2048_s16 }
 0xa41   : > { %s2323_s21 = smov %s1895_s22  ;;  %27 = sbr.rel (!%p25_p5) target bundleno = 9 (0x9), region = 116 }
 0xa44   : > { %s2324_s22 = smov %s2319_s28 }
 0xa48   :  { %1476 = vsyncpa [#allocation4], 1 }
 0xa49   :  { %1478 = vsyncpa [#allocation4 + $0x1], 1 }

</bundles_post_ra>
